<compile_context>
chip_gen: v6e
topology: v6e:2x2x1
jax: 0.10.0
libtpu: 0.0.40
codegen_flags: <defaults>
</compile_context>

<pallas_src>
import functools

import jax
import jax.numpy as jnp
from jax.experimental import pallas as pl
from jax.experimental.pallas import tpu as pltpu


# --------------------------------------------------------------------------------------
# Kernels
# --------------------------------------------------------------------------------------
def _expert_fused_kernel(x_ref, g_ref, b_ref,
                         w1_ref, b1_ref, w3_ref, b3_ref, w2_ref, b2_ref,
                         o_ref, *, residual: bool, eps: float):
    """Single-pass kernel: all weights resident in VMEM, grid over token tiles only."""
    x = x_ref[...].astype(jnp.float32)

    # LayerNorm (f32)
    mean = jnp.mean(x, axis=-1, keepdims=True)
    xc = x - mean
    var = jnp.mean(xc * xc, axis=-1, keepdims=True)
    xn = xc * jax.lax.rsqrt(var + eps)
    xn = xn * g_ref[...].astype(jnp.float32) + b_ref[...].astype(jnp.float32)
    xn = xn.astype(w1_ref.dtype)                       # MXU operand dtype

    # SwiGLU: silu(xn @ w1 + b1) * (xn @ w3 + b3)
    h1 = jnp.dot(xn, w1_ref[...], preferred_element_type=jnp.float32) \
        + b1_ref[...].astype(jnp.float32)
    h3 = jnp.dot(xn, w3_ref[...], preferred_element_type=jnp.float32) \
        + b3_ref[...].astype(jnp.float32)
    h = (h1 * jax.nn.sigmoid(h1)) * h3                 # VPU/EUP, f32

    # Output projection (+ bias, + residual)
    out = jnp.dot(h.astype(w2_ref.dtype), w2_ref[...],
                  preferred_element_type=jnp.float32) + b2_ref[...].astype(jnp.float32)
    if residual:
        out = out + x
    o_ref[...] = out.astype(o_ref.dtype)


def _expert_tiled_kernel(x_ref, g_ref, b_ref,
                         w1_ref, b1_ref, w3_ref, b3_ref, w2_ref, b2_ref,
                         o_ref, xn_ref, acc_ref, *, residual: bool, eps: float):
    """Hidden-tiled kernel: grid=(token_tiles, hidden_tiles), f32 accumulator in VMEM."""
    j = pl.program_id(1)

    # ---- LayerNorm once per token tile (reused across all hidden steps) ----
    @pl.when(j == 0)
    def _():
        x = x_ref[...].astype(jnp.float32)
        mean = jnp.mean(x, axis=-1, keepdims=True)
        xc = x - mean
        var = jnp.mean(xc * xc, axis=-1, keepdims=True)
        xn = xc * jax.lax.rsqrt(var + eps)
        xn = xn * g_ref[...].astype(jnp.float32) + b_ref[...].astype(jnp.float32)
        xn_ref[...] = xn.astype(xn_ref.dtype)          # stored in weight (MXU operand) dtype
        acc_ref[...] = jnp.zeros_like(acc_ref)

    # ---- SwiGLU on this hidden slice ----
    xn = xn_ref[...]
    h1 = jnp.dot(xn, w1_ref[...], preferred_element_type=jnp.float32) \
        + b1_ref[...].astype(jnp.float32)
    h3 = jnp.dot(xn, w3_ref[...], preferred_element_type=jnp.float32) \
        + b3_ref[...].astype(jnp.float32)
    h = (h1 * jax.nn.sigmoid(h1)) * h3

    # ---- Partial output projection: accumulate h @ w2[slice] in f32 ----
    acc_ref[...] += jnp.dot(h.astype(w2_ref.dtype), w2_ref[...],
                            preferred_element_type=jnp.float32)

    # ---- Finalize: add b2 (+ residual) and write out ----
    @pl.when(j == pl.num_programs(1) - 1)
    def _():
        out = acc_ref[...] + b2_ref[...].astype(jnp.float32)
        if residual:
            out = out + x_ref[...].astype(jnp.float32)
        o_ref[...] = out.astype(o_ref.dtype)


# --------------------------------------------------------------------------------------
# Wrapper
# --------------------------------------------------------------------------------------
def _round_up(x, m):
    return (x + m - 1) // m * m


def _pick_tn(hidden, max_tn=512):
    # Largest lane-dense (multiple-of-128) tile that divides hidden; else full hidden.
    for cand in (max_tn, 256, 128):
        if hidden % cand == 0:
            return cand
    return hidden


def expert_forward(x, params, *, residual=False, eps=1e-5, tm=256, tn=None):
    """x: (..., dim). Returns same shape/dtype as x.

    tn=None  -> auto: single-pass fused kernel if the weights fit in VMEM, otherwise
                hidden-tiled kernel with an auto-picked hidden tile.
    tn=int   -> force the hidden-tiled kernel with this hidden tile (must divide hidden).
    """
    orig_shape = x.shape
    dim = orig_shape[-1]
    x2 = x.reshape(-1, dim)
    n = x2.shape[0]

    gamma, beta = params["gamma"], params["beta"]
    w1, b1 = params["w1"], params["b1"]
    w3, b3 = params["w3"], params["b3"]
    w2, b2 = params["w2"], params["b2"]
    hidden = w1.shape[1]
    w_dtype = w1.dtype
    w_bytes = jnp.dtype(w_dtype).itemsize
    x_bytes = x2.dtype.itemsize

    # Token tile: at least one sublane-group (8), padded to a multiple of tm.
    tm = max(8, min(tm, _round_up(n, 8)))
    n_pad = _round_up(n, tm)
    if n_pad != n:
        x2 = jnp.pad(x2, ((0, n_pad - n), (0, 0)))

    # 2-D views for clean (sublane, lane) layout
    gamma2 = gamma.reshape(1, dim)
    beta2 = beta.reshape(1, dim)
    b1_2 = b1.reshape(1, hidden)
    b3_2 = b3.reshape(1, hidden)
    b2_2 = b2.reshape(1, dim)

    cost = pl.CostEstimate(
        flops=6 * n_pad * dim * hidden,
        transcendentals=n_pad * hidden,
        bytes_accessed=3 * dim * hidden * w_bytes + 2 * n_pad * dim * x_bytes,
    )

    # Decide path: fused single-pass if weights (double-buffered allocation) + activation
    # tiles comfortably fit in VMEM on all chips (v7x: 64 MiB physical).
    weight_tile_bytes = 3 * dim * hidden * w_bytes
    act_tile_bytes = 2 * 2 * tm * dim * x_bytes
    fused_footprint = 2 * weight_tile_bytes + act_tile_bytes + (4 << 20)
    use_fused = (tn is None) and (fused_footprint <= (40 << 20))

    if use_fused:
        grid = (n_pad // tm,)
        kernel = functools.partial(_expert_fused_kernel, residual=residual, eps=eps)
        vmem_bytes = int(min(max(fused_footprint + (4 << 20), 32 << 20), 64 << 20))
        out = pl.pallas_call(
            kernel,
            out_shape=jax.ShapeDtypeStruct((n_pad, dim), x.dtype),
            grid_spec=pltpu.PrefetchScalarGridSpec(
                num_scalar_prefetch=0,
                grid=grid,
                in_specs=[
                    pl.BlockSpec((tm, dim), lambda i: (i, 0)),        # x tile
                    pl.BlockSpec((1, dim), lambda i: (0, 0)),         # gamma
                    pl.BlockSpec((1, dim), lambda i: (0, 0)),         # beta
                    pl.BlockSpec((dim, hidden), lambda i: (0, 0)),    # w1 (resident)
                    pl.BlockSpec((1, hidden), lambda i: (0, 0)),      # b1
                    pl.BlockSpec((dim, hidden), lambda i: (0, 0)),    # w3 (resident)
                    pl.BlockSpec((1, hidden), lambda i: (0, 0)),      # b3
                    pl.BlockSpec((hidden, dim), lambda i: (0, 0)),    # w2 (resident)
                    pl.BlockSpec((1, dim), lambda i: (0, 0)),         # b2
                ],
                out_specs=pl.BlockSpec((tm, dim), lambda i: (i, 0)),
            ),
            compiler_params=pltpu.CompilerParams(
                dimension_semantics=("parallel",),
                vmem_limit_bytes=vmem_bytes,
            ),
            cost_estimate=cost,
        )(x2, gamma2, beta2, w1, b1_2, w3, b3_2, w2, b2_2)
    else:
        tn = _pick_tn(hidden) if tn is None else tn
        assert hidden % tn == 0, "tn must divide hidden"
        grid = (n_pad // tm, hidden // tn)
        kernel = functools.partial(_expert_tiled_kernel, residual=residual, eps=eps)

        # VMEM budget: double-buffered streamed weight tiles + x/out tiles + persistent scratch.
        vmem_bytes = (
            2 * (2 * dim * tn + tn * dim) * w_bytes      # w1, w3 (dim,tn) + w2 (tn,dim) tiles
            + 2 * 2 * tm * dim * x_bytes                 # x in + out tiles
            + tm * dim * (w_bytes + 4)                   # xn scratch + f32 accumulator
            + 2 * (3 * dim + 2 * tn) * 4                 # gamma/beta/bias rows
            + (4 << 20)                                  # headroom
        )
        vmem_bytes = int(min(max(vmem_bytes, 32 << 20), 64 << 20))  # safe on v5e/v6e/v7x

        out = pl.pallas_call(
            kernel,
            out_shape=jax.ShapeDtypeStruct((n_pad, dim), x.dtype),
            grid_spec=pltpu.PrefetchScalarGridSpec(
                num_scalar_prefetch=0,
                grid=grid,
                in_specs=[
                    pl.BlockSpec((tm, dim), lambda i, j: (i, 0)),    # x tile (resident over j)
                    pl.BlockSpec((1, dim), lambda i, j: (0, 0)),     # gamma
                    pl.BlockSpec((1, dim), lambda i, j: (0, 0)),     # beta
                    pl.BlockSpec((dim, tn), lambda i, j: (0, j)),    # w1 column tile
                    pl.BlockSpec((1, tn), lambda i, j: (0, j)),      # b1 slice
                    pl.BlockSpec((dim, tn), lambda i, j: (0, j)),    # w3 column tile
                    pl.BlockSpec((1, tn), lambda i, j: (0, j)),      # b3 slice
                    pl.BlockSpec((tn, dim), lambda i, j: (j, 0)),    # w2 row tile
                    pl.BlockSpec((1, dim), lambda i, j: (0, 0)),     # b2
                ],
                out_specs=pl.BlockSpec((tm, dim), lambda i, j: (i, 0)),
                scratch_shapes=[
                    pltpu.VMEM((tm, dim), w_dtype),      # normalized x (MXU operand dtype)
                    pltpu.VMEM((tm, dim), jnp.float32),  # f32 output accumulator
                ],
            ),
            compiler_params=pltpu.CompilerParams(
                dimension_semantics=("parallel", "arbitrary"),
                vmem_limit_bytes=vmem_bytes,
            ),
            cost_estimate=cost,
        )(x2, gamma2, beta2, w1, b1_2, w3, b3_2, w2, b2_2)

    if n_pad != n:
        out = out[:n]
    return out.reshape(orig_shape)


# --------------------------------------------------------------------------------------
# Params + reference
# --------------------------------------------------------------------------------------
def init_expert_params(key, dim, hidden_dim=64, dtype=jnp.float32):
    """Deterministic synthetic params. Linear weights stored (in, out)."""
    k1, k2, k3, k4, k5, k6 = jax.random.split(key, 6)
    s_in = 1.0 / jnp.sqrt(dim)
    s_h = 1.0 / jnp.sqrt(hidden_dim)
    return {
        "gamma": jnp.ones((dim,), dtype),
        "beta": jnp.zeros((dim,), dtype),
        "w1": (jax.random.uniform(k1, (dim, hidden_dim), dtype, -1, 1) * s_in),
        "b1": (jax.random.uniform(k2, (hidden_dim,), dtype, -1, 1) * s_in),
        "w3": (jax.random.uniform(k3, (dim, hidden_dim), dtype, -1, 1) * s_in),
        "b3": (jax.random.uniform(k4, (hidden_dim,), dtype, -1, 1) * s_in),
        "w2": (jax.random.uniform(k5, (hidden_dim, dim), dtype, -1, 1) * s_h),
        "b2": (jax.random.uniform(k6, (dim,), dtype, -1, 1) * s_h),
    }


def expert_reference(x, params, *, residual=False, eps=1e-5):
    """Pure-JAX reference for correctness check."""
    y = x if residual else 0.0
    p = {k: v.astype(jnp.float32) for k, v in params.items()}
    xf = x.astype(jnp.float32)
    mean = jnp.mean(xf, axis=-1, keepdims=True)
    var = jnp.mean((xf - mean) ** 2, axis=-1, keepdims=True)
    xn = (xf - mean) * jax.lax.rsqrt(var + eps)
    xn = xn * p["gamma"] + p["beta"]
    h1 = xn @ p["w1"] + p["b1"]
    h3 = xn @ p["w3"] + p["b3"]
    h = jax.nn.silu(h1) * h3
    return (h @ p["w2"] + p["b2"] + y).astype(x.dtype)


if __name__ == "__main__":
    key = jax.random.PRNGKey(0)
    kx, kp, kx2, kp2 = jax.random.split(key, 4)

    # Small demo matching the torch module defaults (dim small, hidden_dim=64) -> fused path.
    batch, seq, dim, hidden = 2, 8, 32, 64
    x = jax.random.normal(kx, (batch, seq, dim), jnp.float32)
    params = init_expert_params(kp, dim, hidden)

    out = jax.block_until_ready(expert_forward(x, params, residual=False))
    ref = expert_reference(x, params, residual=False)
    assert out.shape == x.shape and out.dtype == x.dtype
    assert jnp.allclose(out, ref, atol=1e-5, rtol=1e-5), "mismatch (no residual)"

    out_res = jax.block_until_ready(expert_forward(x, params, residual=True))
    ref_res = expert_reference(x, params, residual=True)
    assert jnp.allclose(out_res, ref_res, atol=1e-5, rtol=1e-5), "mismatch (residual)"

    # Exercise the hidden-tiled path (grid j>1), f32 accumulator, and ragged-token padding.
    dim2, hidden2 = 128, 384          # tn=128 -> 3 hidden steps; 20 tokens -> padded tile
    x2 = jax.random.normal(kx2, (4, 5, dim2), jnp.float32)
    params2 = init_expert_params(kp2, dim2, hidden2)
    out2 = jax.block_until_ready(expert_forward(x2, params2, residual=True, tn=128))
    ref2 = expert_reference(x2, params2, residual=True)
    assert jnp.allclose(out2, ref2, atol=1e-4, rtol=1e-4), "mismatch (tiled hidden)"

    # bf16-weight paths: activations downcast at the dot inputs, f32 MXU accumulation.
    params_bf16 = {k: v.astype(jnp.bfloat16) for k, v in params2.items()}
    out_bf = jax.block_until_ready(expert_forward(x2, params_bf16, residual=False))
    ref_bf = expert_reference(x2, params_bf16, residual=False)
    assert jnp.allclose(out_bf, ref_bf, atol=5e-2, rtol=5e-2), "mismatch (bf16 fused)"

    out_bf_t = jax.block_until_ready(expert_forward(x2, params_bf16, residual=True, tn=128))
    ref_bf_t = expert_reference(x2, params_bf16, residual=True)
    assert jnp.allclose(out_bf_t, ref_bf_t, atol=5e-2, rtol=5e-2), "mismatch (bf16 tiled)"

    print("KERNEL_OK")
</pallas_src>

<mosaic_0001>
module attributes {stable_mosaic.version = 11 : i64} {
  func.func @_expert_fused_kernel(%arg0: i32, %arg1: memref<16x32xf32, #tpu.memory_space<vmem>>, %arg2: memref<1x32xf32, #tpu.memory_space<vmem>>, %arg3: memref<1x32xf32, #tpu.memory_space<vmem>>, %arg4: memref<32x64xf32, #tpu.memory_space<vmem>>, %arg5: memref<1x64xf32, #tpu.memory_space<vmem>>, %arg6: memref<32x64xf32, #tpu.memory_space<vmem>>, %arg7: memref<1x64xf32, #tpu.memory_space<vmem>>, %arg8: memref<64x32xf32, #tpu.memory_space<vmem>>, %arg9: memref<1x32xf32, #tpu.memory_space<vmem>>, %arg10: memref<16x32xf32, #tpu.memory_space<vmem>>) attributes {dimension_semantics = [#tpu.dimension_semantics<parallel>], iteration_bounds = array<i64: 1>, scalar_prefetch = 0 : i64, scratch_operands = 0 : i64, tpu.core_type = #tpu.core_type<tc>, window_params = [{transform_indices = @transform_0, window_bounds = array<i64: 16, 32>}, {pipeline_mode = #tpu.pipeline_mode<synchronous>, transform_indices = @transform_1, window_bounds = array<i64: 1, 32>}, {pipeline_mode = #tpu.pipeline_mode<synchronous>, transform_indices = @transform_2, window_bounds = array<i64: 1, 32>}, {pipeline_mode = #tpu.pipeline_mode<synchronous>, transform_indices = @transform_3, window_bounds = array<i64: 32, 64>}, {pipeline_mode = #tpu.pipeline_mode<synchronous>, transform_indices = @transform_4, window_bounds = array<i64: 1, 64>}, {pipeline_mode = #tpu.pipeline_mode<synchronous>, transform_indices = @transform_5, window_bounds = array<i64: 32, 64>}, {pipeline_mode = #tpu.pipeline_mode<synchronous>, transform_indices = @transform_6, window_bounds = array<i64: 1, 64>}, {pipeline_mode = #tpu.pipeline_mode<synchronous>, transform_indices = @transform_7, window_bounds = array<i64: 64, 32>}, {pipeline_mode = #tpu.pipeline_mode<synchronous>, transform_indices = @transform_8, window_bounds = array<i64: 1, 32>}, {transform_indices = @transform_9, window_bounds = array<i64: 16, 32>}]} {
    %c0 = arith.constant 0 : index
    %c0_0 = arith.constant 0 : index
    %0 = vector.load %arg1[%c0, %c0_0] : memref<16x32xf32, #tpu.memory_space<vmem>>, vector<16x32xf32>
    %cst = arith.constant dense<0.000000e+00> : vector<16xf32>
    %1 = vector.multi_reduction <add>, %0, %cst [1] : vector<16x32xf32> to vector<16xf32>
    %2 = vector.shape_cast %1 : vector<16xf32> to vector<16x1xf32>
    %cst_1 = arith.constant 3.200000e+01 : f32
    %3 = vector.broadcast %cst_1 : f32 to vector<16x1xf32>
    %4 = arith.divf %2, %3 : vector<16x1xf32>
    %5 = vector.broadcast %4 : vector<16x1xf32> to vector<16x32xf32>
    %6 = arith.subf %0, %5 : vector<16x32xf32>
    %7 = arith.mulf %6, %6 : vector<16x32xf32>
    %cst_2 = arith.constant dense<0.000000e+00> : vector<16xf32>
    %8 = vector.multi_reduction <add>, %7, %cst_2 [1] : vector<16x32xf32> to vector<16xf32>
    %9 = vector.shape_cast %8 : vector<16xf32> to vector<16x1xf32>
    %cst_3 = arith.constant 3.200000e+01 : f32
    %10 = vector.broadcast %cst_3 : f32 to vector<16x1xf32>
    %11 = arith.divf %9, %10 : vector<16x1xf32>
    %cst_4 = arith.constant 9.99999974E-6 : f32
    %12 = vector.broadcast %cst_4 : f32 to vector<16x1xf32>
    %13 = arith.addf %11, %12 : vector<16x1xf32>
    %14 = math.rsqrt %13 : vector<16x1xf32>
    %15 = vector.broadcast %14 : vector<16x1xf32> to vector<16x32xf32>
    %16 = arith.mulf %6, %15 : vector<16x32xf32>
    %c0_5 = arith.constant 0 : index
    %c0_6 = arith.constant 0 : index
    %17 = vector.load %arg2[%c0_5, %c0_6] : memref<1x32xf32, #tpu.memory_space<vmem>>, vector<1x32xf32>
    %18 = vector.broadcast %17 : vector<1x32xf32> to vector<16x32xf32>
    %19 = arith.mulf %16, %18 : vector<16x32xf32>
    %c0_7 = arith.constant 0 : index
    %c0_8 = arith.constant 0 : index
    %20 = vector.load %arg3[%c0_7, %c0_8] : memref<1x32xf32, #tpu.memory_space<vmem>>, vector<1x32xf32>
    %21 = vector.broadcast %20 : vector<1x32xf32> to vector<16x32xf32>
    %22 = arith.addf %19, %21 : vector<16x32xf32>
    %c0_9 = arith.constant 0 : index
    %c0_10 = arith.constant 0 : index
    %23 = vector.load %arg4[%c0_9, %c0_10] : memref<32x64xf32, #tpu.memory_space<vmem>>, vector<32x64xf32>
    %cst_11 = arith.constant dense<0.000000e+00> : vector<16x64xf32>
    %24 = tpu.matmul %22, %23, %cst_11 {dimension_numbers = #tpu.dot_dimension_numbers<[1], [0], [0], [1], [0, 0, 1, 1], [], []>} : vector<16x32xf32>, vector<32x64xf32>, vector<16x64xf32> -> vector<16x64xf32>
    %c0_12 = arith.constant 0 : index
    %c0_13 = arith.constant 0 : index
    %25 = vector.load %arg5[%c0_12, %c0_13] : memref<1x64xf32, #tpu.memory_space<vmem>>, vector<1x64xf32>
    %26 = vector.broadcast %25 : vector<1x64xf32> to vector<16x64xf32>
    %27 = arith.addf %24, %26 : vector<16x64xf32>
    %c0_14 = arith.constant 0 : index
    %c0_15 = arith.constant 0 : index
    %28 = vector.load %arg6[%c0_14, %c0_15] : memref<32x64xf32, #tpu.memory_space<vmem>>, vector<32x64xf32>
    %cst_16 = arith.constant dense<0.000000e+00> : vector<16x64xf32>
    %29 = tpu.matmul %22, %28, %cst_16 {dimension_numbers = #tpu.dot_dimension_numbers<[1], [0], [0], [1], [0, 0, 1, 1], [], []>} : vector<16x32xf32>, vector<32x64xf32>, vector<16x64xf32> -> vector<16x64xf32>
    %c0_17 = arith.constant 0 : index
    %c0_18 = arith.constant 0 : index
    %30 = vector.load %arg7[%c0_17, %c0_18] : memref<1x64xf32, #tpu.memory_space<vmem>>, vector<1x64xf32>
    %31 = vector.broadcast %30 : vector<1x64xf32> to vector<16x64xf32>
    %32 = arith.addf %29, %31 : vector<16x64xf32>
    %33 = arith.negf %27 : vector<16x64xf32>
    %34 = math.exp %33 : vector<16x64xf32>
    %cst_19 = arith.constant 1.000000e+00 : f32
    %35 = vector.broadcast %cst_19 : f32 to vector<16x64xf32>
    %36 = arith.addf %35, %34 : vector<16x64xf32>
    %37 = arith.divf %35, %36 : vector<16x64xf32>
    %38 = arith.mulf %27, %37 : vector<16x64xf32>
    %39 = arith.mulf %38, %32 : vector<16x64xf32>
    %c0_20 = arith.constant 0 : index
    %c0_21 = arith.constant 0 : index
    %40 = vector.load %arg8[%c0_20, %c0_21] : memref<64x32xf32, #tpu.memory_space<vmem>>, vector<64x32xf32>
    %cst_22 = arith.constant dense<0.000000e+00> : vector<16x32xf32>
    %41 = tpu.matmul %39, %40, %cst_22 {dimension_numbers = #tpu.dot_dimension_numbers<[1], [0], [0], [1], [0, 0, 1, 1], [], []>} : vector<16x64xf32>, vector<64x32xf32>, vector<16x32xf32> -> vector<16x32xf32>
    %c0_23 = arith.constant 0 : index
    %c0_24 = arith.constant 0 : index
    %42 = vector.load %arg9[%c0_23, %c0_24] : memref<1x32xf32, #tpu.memory_space<vmem>>, vector<1x32xf32>
    %43 = vector.broadcast %42 : vector<1x32xf32> to vector<16x32xf32>
    %44 = arith.addf %41, %43 : vector<16x32xf32>
    %c0_25 = arith.constant 0 : index
    %c0_26 = arith.constant 0 : index
    %45 = vector.load %arg10[%c0_25, %c0_26] : memref<16x32xf32, #tpu.memory_space<vmem>>, vector<16x32xf32>
    tpu.vector_store %arg10[%c0_25, %c0_26], %44 {strides = array<i32>} : memref<16x32xf32, #tpu.memory_space<vmem>>, vector<16x32xf32>,
    return
  }
  func.func @transform_0(%arg0: i32) -> (i32, i32) {
    %c0_i32 = arith.constant 0 : i32
    %c0_i32_0 = arith.constant 0 : i32
    return %arg0, %c0_i32 : i32, i32
  }
  func.func @transform_1(%arg0: i32) -> (i32, i32) {
    %c0_i32 = arith.constant 0 : i32
    %c0_i32_0 = arith.constant 0 : i32
    %c0_i32_1 = arith.constant 0 : i32
    return %c0_i32, %c0_i32_0 : i32, i32
  }
  func.func @transform_2(%arg0: i32) -> (i32, i32) {
    %c0_i32 = arith.constant 0 : i32
    %c0_i32_0 = arith.constant 0 : i32
    %c0_i32_1 = arith.constant 0 : i32
    return %c0_i32, %c0_i32_0 : i32, i32
  }
  func.func @transform_3(%arg0: i32) -> (i32, i32) {
    %c0_i32 = arith.constant 0 : i32
    %c0_i32_0 = arith.constant 0 : i32
    %c0_i32_1 = arith.constant 0 : i32
    return %c0_i32, %c0_i32_0 : i32, i32
  }
  func.func @transform_4(%arg0: i32) -> (i32, i32) {
    %c0_i32 = arith.constant 0 : i32
    %c0_i32_0 = arith.constant 0 : i32
    %c0_i32_1 = arith.constant 0 : i32
    return %c0_i32, %c0_i32_0 : i32, i32
  }
  func.func @transform_5(%arg0: i32) -> (i32, i32) {
    %c0_i32 = arith.constant 0 : i32
    %c0_i32_0 = arith.constant 0 : i32
    %c0_i32_1 = arith.constant 0 : i32
    return %c0_i32, %c0_i32_0 : i32, i32
  }
  func.func @transform_6(%arg0: i32) -> (i32, i32) {
    %c0_i32 = arith.constant 0 : i32
    %c0_i32_0 = arith.constant 0 : i32
    %c0_i32_1 = arith.constant 0 : i32
    return %c0_i32, %c0_i32_0 : i32, i32
  }
  func.func @transform_7(%arg0: i32) -> (i32, i32) {
    %c0_i32 = arith.constant 0 : i32
    %c0_i32_0 = arith.constant 0 : i32
    %c0_i32_1 = arith.constant 0 : i32
    return %c0_i32, %c0_i32_0 : i32, i32
  }
  func.func @transform_8(%arg0: i32) -> (i32, i32) {
    %c0_i32 = arith.constant 0 : i32
    %c0_i32_0 = arith.constant 0 : i32
    %c0_i32_1 = arith.constant 0 : i32
    return %c0_i32, %c0_i32_0 : i32, i32
  }
  func.func @transform_9(%arg0: i32) -> (i32, i32) {
    %c0_i32 = arith.constant 0 : i32
    %c0_i32_0 = arith.constant 0 : i32
    return %arg0, %c0_i32 : i32, i32
  }
}

</mosaic_0001>

<bundles_post_ra>
// kernel: tpu_custom_call.1
= control target key start
LH: loop header
LB: loop body
LE: loop exit
PB: predicated region body
PF: predicated region fallthrough
CT: control target
= control target key end

     0   :  { %vm35_vm0 = vcmask 261120   ;;  %s638_s0 = inlined_call_operand.vmem [shape: f32[16,32], index: 0, kind: input, shape index: {}]   ;;  %s639_s1 = inlined_call_operand.vmem [shape: f32[1,32], index: 1, kind: input, shape index: {}]   ;;  %s640_s2 = inlined_call_operand.vmem [shape: f32[1,32], index: 2, kind: input, shape index: {}]   ;;  %s641_s3 = inlined_call_operand.vmem [shape: f32[32,64], index: 3, kind: input, shape index: {}]   ;;  %s642_s4 = inlined_call_operand.vmem [shape: f32[1,64], index: 4, kind: input, shape index: {}]   ;;  %s643_s5 = inlined_call_operand.vmem [shape: f32[32,64], index: 5, kind: input, shape index: {}]   ;;  %s644_s6 = inlined_call_operand.vmem [shape: f32[1,64], index: 6, kind: input, shape index: {}]   ;;  %s645_s7 = inlined_call_operand.vmem [shape: f32[64,32], index: 7, kind: input, shape index: {}]   ;;  %s646_s8 = inlined_call_operand.vmem [shape: f32[1,32], index: 8, kind: input, shape index: {}]   ;;  %s647_s9 = inlined_call_operand.hbm [shape: f32[16,32], index: 9, kind: output, shape index: {}]  }
   0x1   :  { %v33_v0 = vld [vmem:[%s638_s0] sm:$0xff]  ;;  %v34_v1 = vld [vmem:[%s638_s0 + $0x8] sm:$0xff] }
   0x2   :  { %14 = vsyncpa [#allocation3], 0  ;;  %v36_v2 = vsel %vm35_vm0, %v33_v0, 0.0  ;;  %v39_v3 = vsel %vm35_vm0, %v34_v1, 0.0  ;;  %v84_v14 = vld [vmem:[%s641_s3 + $0x18] sm:$0xff]  ;;  %v83_v15 = vld [vmem:[%s641_s3 + $0x10] sm:$0xff] }
   0x3   :  { %37 = vadd.xlane.f32.xlu0 %v36_v2  ;;  %425 = vmatprep.subr.mxu1 %v84_v14  ;;  %v82_v16 = vld [vmem:[%s641_s3 + $0x8] sm:$0xff]  ;;  %v81_v17 = vld [vmem:[%s641_s3] sm:$0xff]  ;;  %v176_v18 = vld [vmem:[%s643_s5 + $0x18] sm:$0xff]  ;;  %vm290_vm1 = vcmask 523264   ;;  %s503_s25 = smov [#allocation2]  }
   0x4   :  { %426 = vmatpush3.msra.mxu1 %v84_v14  ;;  %v390_v26 = vld [vmem:[%s639_s1] ss:$0 sm:$0xff]  ;;  %v175_v35 = vld [vmem:[%s643_s5 + $0x10] sm:$0xff]  ;;  %v174_v36 = vld [vmem:[%s643_s5 + $0x8] sm:$0xff]  ;;  %s379_s26 = sshll.u32 %s503_s25, 4  ;;  %s380_s26 = int_to_ptr.vmem [resolvable:$true] %s379_s26 }
   0x5   :  { %427 = vmatprep.subr.mxu1 %v83_v15  ;;  %v391_v28 = vld [vmem:[%s640_s2] ss:$0 sm:$0xff]  ;;  %v282_v38 = vld [vmem:[%s645_s7 + $0x38] sm:$0xff]  ;;  %v281_v39 = vld [vmem:[%s645_s7 + $0x30] sm:$0xff]  ;;  %p486_p1 = scmp.lt.s32.totalorder %s380_s26, %s380_s26 }
   0x6   :  { %428 = vmatpush3.msra.mxu1 %v83_v15  ;;  %v173_v37 = vld [vmem:[%s643_s5] sm:$0xff]  ;;  %447 = vmatprep.subr.mxu0 %v282_v38  ;;  %v280_v40 = vld [vmem:[%s645_s7 + $0x28] sm:$0xff]  ;;  %v278_v42 = vld [vmem:[%s645_s7 + $0x18] sm:$0xff] }
   0x7   :  { %40 = vadd.xlane.f32.xlu0 %v39_v3  ;;  %429 = vmatprep.subr.mxu1 %v82_v16  ;;  %v279_v41 = vld [vmem:[%s645_s7 + $0x20] sm:$0xff]  ;;  %v277_v43 = vld [vmem:[%s645_s7 + $0x10] sm:$0xff]  ;;  %v276_v44 = vld [vmem:[%s645_s7 + $0x8] sm:$0xff] }
   0x8   :  { %430 = vmatpush3.msra.mxu1 %v82_v16  ;;  %448 = vmatpush3.msra.mxu0 %v282_v38  ;;  %v275_v45 = vld [vmem:[%s645_s7] sm:$0xff] }
   0x9   :  { %431 = vmatprep.subr.mxu1 %v81_v17  ;;  %449 = vmatprep.subr.mxu0 %v281_v39  ;;  %v392_v46 = vld [vmem:[%s642_s4] ss:$0 sm:$0xff] }
   0xa   :  { %432 = vmatpush3.msra.mxu1 %v81_v17  ;;  %450 = vmatpush3.msra.mxu0 %v281_v39  ;;  %v395_v60 = vld [vmem:[%s644_s6] ss:$0 sm:$0xff]  ;;  %s481_s6 = scalar_lea.vmem %s380_s26, 256 }
   0xb   :  { %436 = vmatprep.subr.mxu1 %v176_v18  ;;  %451 = vmatprep.subr.mxu0 %v280_v40  ;;  %p482_p0 = scmp.ne.s32.totalorder %s380_s26, %s481_s6  ;;  %p487_p2 = scmp.lt.s32.totalorder %s481_s6, %s481_s6 }
   0xc   :  { %452 = vmatpush3.msra.mxu0 %v280_v40 }
   0xd   :  { %453 = vmatprep.subr.mxu0 %v279_v41  ;;  %p488_p3 = por %p487_p2, %p486_p1 }
   0xe   :  { %454 = vmatpush3.msra.mxu0 %v279_v41 }
   0xf   :  { %455 = vmatprep.subr.mxu0 %v278_v42  ;;  %p489_p4 = pnand %p488_p3, %p482_p0 }
  0x10   :  { %456 = vmatpush3.msra.mxu0 %v278_v42 }
  0x11   :  { %457 = vmatprep.subr.mxu0 %v277_v43 }
  0x12   :  { %458 = vmatpush3.msra.mxu0 %v277_v43 }
  0x13   :  { %459 = vmatprep.subr.mxu0 %v276_v44 }
  0x14   :  { %460 = vmatpush3.msra.mxu0 %v276_v44 }
  0x15   :  { %461 = vmatprep.subr.mxu0 %v275_v45 }
  0x16   :  { %462 = vmatpush3.msra.mxu0 %v275_v45 }
  0x8c   :  { %v38_v4 = vpop.xlane.xlu0 %37 }
  0x8d   :  { %v43_v5 = vmul.f32 0.03125, %v38_v4  ;;  %v400_v4 = vld [vmem:[%s646_s8] ss:$0 sm:$0xff] }
  0x8f   :  { %v45_v6 = vsub.f32 %v33_v0, %v43_v5 }
  0x90   :  { %v41_v7 = vpop.xlane.xlu0 %40 }
  0x91   :  { %v44_v8 = vmul.f32 0.03125, %v41_v7  ;;  %v47_v9 = vmul.f32 %v45_v6, %v45_v6 }
  0x93   :  { %v46_v10 = vsub.f32 %v34_v1, %v44_v8  ;;  %v49_v11 = vsel %vm35_vm0, %v47_v9, 0.0 }
  0x94   :  { %50 = vadd.xlane.f32.xlu1 %v49_v11 }
  0x95   :  { %v48_v12 = vmul.f32 %v46_v10, %v46_v10 }
  0x97   :  { %v52_v13 = vsel %vm35_vm0, %v48_v12, 0.0 }
  0x98   :  { %53 = vadd.xlane.f32.xlu1 %v52_v13 }
 0x11d   :  { %v51_v19 = vpop.xlane.xlu1 %50 }
 0x11e   :  { %v55_v20 = vmul.f32 0.03125, %v51_v19 }
 0x120   :  { %v57_v21 = vadd.f32 1e-05, %v55_v20 }
 0x121   :  { %v54_v22 = vpop.xlane.xlu1 %53 }
 0x122   :  { %469 = vrsqrt.f32 %v57_v21  ;;  %v56_v23 = vmul.f32 0.03125, %v54_v22 }
 0x124   :  { %v58_v24 = vadd.f32 1e-05, %v56_v23 }
 0x126   :  { %471 = vrsqrt.f32 %v58_v24 }
 0x12f   :  { %v470_v25 = vpop.eup %469 }
 0x130   :  { %v61_v27 = vmul.f32 %v470_v25, %v45_v6 }
 0x132   :  { %v70_v29 = vmul.f32 %v390_v26, %v61_v27 }
 0x133   :  { %v472_v30 = vpop.eup %471 }
 0x134   :  { %v62_v31 = vmul.f32 %v472_v30, %v46_v10  ;;  %v79_v32 = vadd.f32 %v391_v28, %v70_v29 }
 0x136   :  { %v71_v33 = vmul.f32 %v390_v26, %v62_v31  ;;  %433 = vmatprep.mubr.msk.f32.mxu1 %vm35_vm0, %v79_v32 }
 0x138   :  { %v80_v34 = vadd.f32 %v391_v28, %v71_v33 }
 0x13a   :  { %434 = vmatmul.mubr.msk.f32.vlgmr.msra.gmra.mxu1 %vm35_vm0, %v80_v34 }
 0x13b   :  { %437 = vmatpush3.msra.mxu1 %v176_v18  ;;  %444 = vmatprep.mubr.msk.f32.mxu1 %vm35_vm0, %v79_v32 }
 0x13c   :  { %438 = vmatprep.subr.mxu1 %v175_v35 }
 0x13d   :  { %439 = vmatpush3.msra.mxu1 %v175_v35 }
 0x13e   :  { %440 = vmatprep.subr.mxu1 %v174_v36 }
 0x13f   :  { %441 = vmatpush3.msra.mxu1 %v174_v36 }
 0x140   :  { %442 = vmatprep.subr.mxu1 %v173_v37 }
 0x141   :  { %443 = vmatpush3.msra.mxu1 %v173_v37 }
 0x142   :  { %445 = vmatmul.mubr.msk.f32.vlgmr.msra.gmra.mxu1 %vm35_vm0, %v80_v34 }
 0x1fa   :  { %v435_v47 = vpop.f32.mrf.mxu1 }
 0x1fb   :  { %v170_v48 = vadd.f32 %v435_v47, %v392_v46 }
 0x1fc   :  { %v164_v49 = vpop.f32.mrf.mxu1 }
 0x1fd   :  { %v399_v50 = vmul.f32 -1.442695, %v170_v48  ;;  %v165_v51 = vadd.f32 %v392_v46, %v164_v49 }
 0x1ff   :  { %473 = vpow2.f32 %v399_v50  ;;  %v398_v52 = vmul.f32 -1.442695, %v165_v51 }
 0x201   :  { %475 = vpow2.f32 %v398_v52 }
 0x202   :  { %v446_v57 = vpop.f32.mrf.mxu1 }
 0x203   :  { %v256_v1 = vadd.f32 %v446_v57, %v395_v60 }
 0x204   :  { %v250_v59 = vpop.f32.mrf.mxu1 }
 0x205   :  { %v251_v0 = vadd.f32 %v395_v60, %v250_v59 }
 0x20c   :  { %v474_v53 = vpop.eup %473 }
 0x20d   :  { %v266_v54 = vadd.f32 1.0, %v474_v53 }
 0x20e   :  { %v476_v55 = vpop.eup %475 }
 0x20f   :  { %477 = vrcp.f32 %v266_v54  ;;  %v265_v56 = vadd.f32 1.0, %v476_v55 }
 0x211   :  { %479 = vrcp.f32 %v265_v56 }
 0x21c   :  { %v478_v58 = vpop.eup %477 }
 0x21d   :  { %v272_v62 = vmul.f32 %v478_v58, %v170_v48 }
 0x21e   :  { %v480_v61 = vpop.eup %479 }
 0x21f   :  { %v271_v63 = vmul.f32 %v480_v61, %v165_v51  ;;  %v274_v3 = vmul.f32 %v272_v62, %v256_v1 }
 0x221   :  { %v273_v2 = vmul.f32 %v271_v63, %v251_v0 }
 0x223   :  { %463 = vmatprep.mubr.msk.f32.mxu0 %vm290_vm1, %v273_v2 }
 0x224   :  { %464 = vmatmul.mubr.msk.f32.vlgmr.msra.gmra.mxu0 %vm290_vm1, %v274_v3 }
 0x2e4   :  { %v465_v5 = vpop.f32.mrf.mxu0 }
 0x2e5   :  { %v369_v6 = vadd.f32 %v465_v5, %v400_v4 }
 0x2e6   :  { %v363_v7 = vpop.f32.mrf.mxu0 }
 0x2e7   :  { %373 = vst.msk [vmem:[#allocation2 + $0x8] sm:$0xff] %vm35_vm0, %v369_v6  ;;  %v364_v8 = vadd.f32 %v400_v4, %v363_v7 }
 0x2e9   :  { %372 = vst.msk [vmem:[#allocation2] sm:$0xff] %vm35_vm0, %v364_v8 }
 0x2ea   :  { %492 = shalt.err (!%p489_p4)
}
 0x2eb   :  { %s504_s1 = smov 128   ;;  %s505_s8 = smov 8  }
 0x2ec   :  { %385 = dma.vmem_to_hbm [thread:$0]  %s380_s26, 256, %s647_s9, [#allocation3], %s504_s1, %s504_s1, %s505_s8  }
 0x2ed   :  { %501 = dma.done.wait [#allocation3], 256  }
 0x2ee   :  { %502 = vsyncadd [#allocation3], 4294967040 }
 0x2ef   :  { %389 = vsyncpa [#allocation3], 1 }

</bundles_post_ra>
